<compile_context>
chip_gen: v7x
topology: tpu7x:2x2x1
jax: 0.10.0
libtpu: 0.0.40
codegen_flags: <defaults>
</compile_context>

<pallas_src>
import functools

import jax
import jax.numpy as jnp
from jax.experimental import pallas as pl
from jax.experimental.pallas import tpu as pltpu

H1 = 400
H2 = 300
H1_PAD = 512        # 400 -> 512; dead cols [400:400+action_dim] carry u
H2_PAD = 384        # 300 -> 384
FLOOR_NEG = -3.0e38  # "no ReLU" floor for the u pass-through columns


def critic_kernel(xu_ref, w1_ref, b1_ref, floor_ref,
                  w2_ref, b2_ref, w3_ref, b3_ref, o_ref,
                  *, bf16_epilogue):
    # ---- layer 1 (+ u pass-through), all on the MXU ----------------------
    # xu = [x | u] (bf16).  W1 has identity rows copying u into h1 columns
    # [H1:H1+action_dim].  `floor` is 0 on real hidden columns (-> ReLU) and
    # FLOOR_NEG on the u columns (-> identity), so one maximum() does both.
    h1 = jnp.dot(xu_ref[...], w1_ref[...], preferred_element_type=jnp.float32)
    if bf16_epilogue:
        # v6e/v7x: native bf16 VALU -> halve the epilogue vreg count.
        h1 = jnp.maximum(h1.astype(jnp.bfloat16) + b1_ref[...].astype(jnp.bfloat16),
                         floor_ref[...].astype(jnp.bfloat16))
    else:
        # v5e and older: no native bf16 VALU, keep the epilogue in f32.
        h1 = jnp.maximum(h1 + b1_ref[...], floor_ref[...]).astype(jnp.bfloat16)

    # ---- layer 2: relu([h1, u] @ W2 + b2) — one MXU pass over K = 512 -----
    # (W2 rows [H1:H1+action_dim] hold the action weights.)
    h2 = jnp.dot(h1, w2_ref[...], preferred_element_type=jnp.float32)
    h2 = jnp.maximum(h2 + b2_ref[...], 0.0)

    # ---- layer 3 (N = 1): VPU multiply + lane reduce, no MXU pass ---------
    q = jnp.sum(h2 * w3_ref[...], axis=-1, keepdims=True) + b3_ref[0, 0]
    o_ref[...] = q.astype(o_ref.dtype)


def _bf16_vpu_default():
    """True on generations with native bf16 VALUs (v6e / v7x)."""
    try:
        kind = jax.devices()[0].device_kind.lower()
    except Exception:
        return True
    return not any(tag in kind for tag in ("v2", "v3", "v4", "v5"))


def critic_forward(x, u, params, *, tb_max=2048, bf16_epilogue=None):
    """x: (B, state_dim) f32, u: (B, action_dim) f32 -> (B, 1) f32."""
    B, state_dim = x.shape
    action_dim = u.shape[1]
    w1, b1, floor, w2, b2, w3, b3 = params
    in_dim = w1.shape[0]
    assert in_dim == state_dim + action_dim
    h1_pad = w1.shape[1]
    h2_pad = w2.shape[1]
    if bf16_epilogue is None:
        bf16_epilogue = _bf16_vpu_default()

    # Inputs hit the MXU in bf16 anyway; cast in the wrapper (halves DMA).
    xu = jnp.concatenate([x, u], axis=1).astype(jnp.bfloat16)

    # Batch tiling: sublane-aligned; prefer >= 2 grid steps so the "parallel"
    # batch axis can shard across both TensorCores on v7x (weights are tiny,
    # per-core duplication is free).
    b8 = pl.cdiv(B, 8) * 8
    tb = min(tb_max, b8)
    if b8 >= 16 and b8 // tb < 2:
        tb = pl.cdiv(b8 // 2, 8) * 8
    bp = pl.cdiv(b8, tb) * tb
    if bp != B:
        xu = jnp.zeros((bp, in_dim), xu.dtype).at[:B].set(xu)
    grid = (bp // tb,)

    batch = lambda i: (i, 0)     # batch-tiled arrays
    const = lambda i: (0, 0)     # weights stay VMEM-resident across grid steps

    flops = 2 * bp * (in_dim * h1_pad + h1_pad * h2_pad + h2_pad)
    bytes_accessed = (xu.size * xu.dtype.itemsize + bp * 4
                      + sum(int(p.size) * p.dtype.itemsize for p in params))

    kernel = functools.partial(critic_kernel, bf16_epilogue=bf16_epilogue)
    out = pl.pallas_call(
        kernel,
        out_shape=jax.ShapeDtypeStruct((bp, 1), jnp.float32),
        grid=grid,
        in_specs=[
            pl.BlockSpec((tb, in_dim), batch),                  # [x | u] (bf16)
            pl.BlockSpec((in_dim, h1_pad), const),              # W1 + u-identity (bf16)
            pl.BlockSpec((1, h1_pad), const),                   # b1
            pl.BlockSpec((1, h1_pad), const),                   # relu/identity floor
            pl.BlockSpec((h1_pad, h2_pad), const),              # W2 (incl. W2u rows, bf16)
            pl.BlockSpec((1, h2_pad), const),                   # b2
            pl.BlockSpec((1, h2_pad), const),                   # W3 row
            pl.BlockSpec(memory_space=pltpu.MemorySpace.SMEM),  # b3 scalar
        ],
        out_specs=pl.BlockSpec((tb, 1), batch),
        compiler_params=pltpu.CompilerParams(
            dimension_semantics=("parallel",),
            vmem_limit_bytes=48 * 1024 * 1024),
        cost_estimate=pl.CostEstimate(
            flops=flops, transcendentals=0, bytes_accessed=bytes_accessed),
    )(xu, w1, b1, floor, w2, b2, w3, b3)
    return out[:B]


def init_raw_params(key, state_dim, action_dim, h1=H1, h2=H2):
    """Deterministic synthetic Critic weights in (in, out) layout (PyTorch W.T)."""
    ks = jax.random.split(key, 6)
    w1 = jax.random.normal(ks[0], (state_dim, h1), jnp.float32) * 0.05
    b1 = jax.random.normal(ks[1], (h1,), jnp.float32) * 0.05
    w2 = jax.random.normal(ks[2], (h1 + action_dim, h2), jnp.float32) * 0.05
    b2 = jax.random.normal(ks[3], (h2,), jnp.float32) * 0.05
    w3 = jax.random.normal(ks[4], (h2,), jnp.float32) * 0.05
    b3 = jax.random.normal(ks[5], (), jnp.float32) * 0.05
    return (w1, b1, w2, b2, w3, b3)


def pack_params(raw, state_dim, action_dim,
                h1=H1, h2=H2, h1_pad=H1_PAD, h2_pad=H2_PAD):
    """Fold the [h1, u] concat into padded, lane-dense kernel parameters.

    * W1 gains `action_dim` identity rows copying u into h1 columns
      [h1 : h1+action_dim] (exact: 1.0 * bf16(u)).
    * `floor` turns layer-1 maximum() into ReLU on the real units, identity
      on the u columns.
    * W2's action rows land at K rows [h1 : h1+action_dim] of the padded W2.
    Zero padding is exact (relu(0)=0, zero rows/cols add nothing).
    MXU weights (W1, W2) are stored in bf16.
    """
    w1, b1, w2, b2, w3, b3 = raw
    in_dim = state_dim + action_dim

    w1p = jnp.zeros((in_dim, h1_pad), jnp.float32)
    w1p = w1p.at[:state_dim, :h1].set(w1)
    w1p = w1p.at[state_dim + jnp.arange(action_dim),
                 h1 + jnp.arange(action_dim)].set(1.0)
    b1p = jnp.zeros((1, h1_pad), jnp.float32).at[0, :h1].set(b1)
    floor = jnp.zeros((1, h1_pad), jnp.float32)
    floor = floor.at[0, h1:h1 + action_dim].set(FLOOR_NEG)

    w2p = jnp.zeros((h1_pad, h2_pad), jnp.float32)
    w2p = w2p.at[:h1, :h2].set(w2[:h1])
    w2p = w2p.at[h1:h1 + action_dim, :h2].set(w2[h1:])
    b2p = jnp.zeros((1, h2_pad), jnp.float32).at[0, :h2].set(b2)
    w3p = jnp.zeros((1, h2_pad), jnp.float32).at[0, :h2].set(w3)
    b3p = jnp.full((1, 1), b3, jnp.float32)

    return (w1p.astype(jnp.bfloat16), b1p, floor,
            w2p.astype(jnp.bfloat16), b2p, w3p, b3p)


def critic_reference(x, u, raw, *, bf16_epilogue):
    """Pure-JAX forward mirroring the PyTorch Critic (explicit concat), with
    the same bf16 quantization as the kernel so the comparison is tight.
    NOTE: bf16 MXU operands/activations => ~1e-3-level deviation vs the true
    f32 PyTorch model; this reference is self-consistent with the kernel."""
    w1, b1, w2, b2, w3, b3 = raw
    xb = x.astype(jnp.bfloat16)
    ub = u.astype(jnp.bfloat16)
    h1 = jnp.dot(xb, w1.astype(jnp.bfloat16), preferred_element_type=jnp.float32)
    if bf16_epilogue:
        h1 = jnp.maximum(h1.astype(jnp.bfloat16) + b1.astype(jnp.bfloat16), 0)
    else:
        h1 = jnp.maximum(h1 + b1, 0.0).astype(jnp.bfloat16)
    xu = jnp.concatenate([h1, ub], axis=1)
    h2 = jnp.dot(xu, w2.astype(jnp.bfloat16), preferred_element_type=jnp.float32)
    h2 = jnp.maximum(h2 + b2, 0.0)
    return jnp.sum(h2 * w3, axis=-1, keepdims=True) + b3


if __name__ == "__main__":
    B, state_dim, action_dim = 2, 16, 4
    key = jax.random.PRNGKey(0)
    kx, ku, kp = jax.random.split(key, 3)

    x = jax.random.normal(kx, (B, state_dim), jnp.float32)
    u = jax.random.normal(ku, (B, action_dim), jnp.float32)

    raw = init_raw_params(kp, state_dim, action_dim)
    params = pack_params(raw, state_dim, action_dim)

    bf16_epilogue = _bf16_vpu_default()
    q = critic_forward(x, u, params, bf16_epilogue=bf16_epilogue)
    jax.block_until_ready(q)

    q_ref = critic_reference(x, u, raw, bf16_epilogue=bf16_epilogue)
    assert q.shape == (B, 1), q.shape
    assert jnp.allclose(q, q_ref, atol=2e-3, rtol=2e-3), (q, q_ref)

    print("KERNEL_OK")
</pallas_src>

<mosaic_0001>
module attributes {stable_mosaic.version = 11 : i64} {
  func.func @critic_kernel(%arg0: i32, %arg1: memref<8x20xbf16, #tpu.memory_space<vmem>>, %arg2: memref<20x512xbf16, #tpu.memory_space<vmem>>, %arg3: memref<1x512xf32, #tpu.memory_space<vmem>>, %arg4: memref<1x512xf32, #tpu.memory_space<vmem>>, %arg5: memref<512x384xbf16, #tpu.memory_space<vmem>>, %arg6: memref<1x384xf32, #tpu.memory_space<vmem>>, %arg7: memref<1x384xf32, #tpu.memory_space<vmem>>, %arg8: memref<1x1xf32, #tpu.memory_space<smem>>, %arg9: memref<8x1xf32, #tpu.memory_space<vmem>>) attributes {dimension_semantics = [#tpu.dimension_semantics<parallel>], iteration_bounds = array<i64: 1>, scalar_prefetch = 0 : i64, scratch_operands = 0 : i64, tpu.core_type = #tpu.core_type<tc>, window_params = [{transform_indices = @transform_0, window_bounds = array<i64: 8, 20>}, {pipeline_mode = #tpu.pipeline_mode<synchronous>, transform_indices = @transform_1, window_bounds = array<i64: 20, 512>}, {pipeline_mode = #tpu.pipeline_mode<synchronous>, transform_indices = @transform_2, window_bounds = array<i64: 1, 512>}, {pipeline_mode = #tpu.pipeline_mode<synchronous>, transform_indices = @transform_3, window_bounds = array<i64: 1, 512>}, {pipeline_mode = #tpu.pipeline_mode<synchronous>, transform_indices = @transform_4, window_bounds = array<i64: 512, 384>}, {pipeline_mode = #tpu.pipeline_mode<synchronous>, transform_indices = @transform_5, window_bounds = array<i64: 1, 384>}, {pipeline_mode = #tpu.pipeline_mode<synchronous>, transform_indices = @transform_6, window_bounds = array<i64: 1, 384>}, {transform_indices = @transform_7, window_bounds = array<i64: 1, 1>}, {transform_indices = @transform_8, window_bounds = array<i64: 8, 1>}]} {
    %c0 = arith.constant 0 : index
    %c0_0 = arith.constant 0 : index
    %0 = vector.load %arg1[%c0, %c0_0] : memref<8x20xbf16, #tpu.memory_space<vmem>>, vector<8x20xbf16>
    %c0_1 = arith.constant 0 : index
    %c0_2 = arith.constant 0 : index
    %1 = vector.load %arg2[%c0_1, %c0_2] : memref<20x512xbf16, #tpu.memory_space<vmem>>, vector<20x512xbf16>
    %cst = arith.constant dense<0.000000e+00> : vector<8x512xf32>
    %2 = tpu.matmul %0, %1, %cst {dimension_numbers = #tpu.dot_dimension_numbers<[1], [0], [0], [1], [0, 0, 1, 1], [], []>} : vector<8x20xbf16>, vector<20x512xbf16>, vector<8x512xf32> -> vector<8x512xf32>
    %3 = arith.truncf %2 : vector<8x512xf32> to vector<8x512xbf16>
    %c0_3 = arith.constant 0 : index
    %c0_4 = arith.constant 0 : index
    %4 = vector.load %arg3[%c0_3, %c0_4] : memref<1x512xf32, #tpu.memory_space<vmem>>, vector<1x512xf32>
    %5 = arith.truncf %4 : vector<1x512xf32> to vector<1x512xbf16>
    %6 = vector.broadcast %5 : vector<1x512xbf16> to vector<8x512xbf16>
    %7 = arith.addf %3, %6 : vector<8x512xbf16>
    %c0_5 = arith.constant 0 : index
    %c0_6 = arith.constant 0 : index
    %8 = vector.load %arg4[%c0_5, %c0_6] : memref<1x512xf32, #tpu.memory_space<vmem>>, vector<1x512xf32>
    %9 = arith.truncf %8 : vector<1x512xf32> to vector<1x512xbf16>
    %10 = vector.broadcast %9 : vector<1x512xbf16> to vector<8x512xbf16>
    %11 = arith.maximumf %7, %10 : vector<8x512xbf16>
    %c0_7 = arith.constant 0 : index
    %c0_8 = arith.constant 0 : index
    %12 = vector.load %arg5[%c0_7, %c0_8] : memref<512x384xbf16, #tpu.memory_space<vmem>>, vector<512x384xbf16>
    %cst_9 = arith.constant dense<0.000000e+00> : vector<8x384xf32>
    %13 = tpu.matmul %11, %12, %cst_9 {dimension_numbers = #tpu.dot_dimension_numbers<[1], [0], [0], [1], [0, 0, 1, 1], [], []>} : vector<8x512xbf16>, vector<512x384xbf16>, vector<8x384xf32> -> vector<8x384xf32>
    %c0_10 = arith.constant 0 : index
    %c0_11 = arith.constant 0 : index
    %14 = vector.load %arg6[%c0_10, %c0_11] : memref<1x384xf32, #tpu.memory_space<vmem>>, vector<1x384xf32>
    %15 = vector.broadcast %14 : vector<1x384xf32> to vector<8x384xf32>
    %16 = arith.addf %13, %15 : vector<8x384xf32>
    %cst_12 = arith.constant 0.000000e+00 : f32
    %17 = vector.broadcast %cst_12 : f32 to vector<8x384xf32>
    %18 = arith.maximumf %16, %17 : vector<8x384xf32>
    %c0_13 = arith.constant 0 : index
    %c0_14 = arith.constant 0 : index
    %19 = vector.load %arg7[%c0_13, %c0_14] : memref<1x384xf32, #tpu.memory_space<vmem>>, vector<1x384xf32>
    %20 = vector.broadcast %19 : vector<1x384xf32> to vector<8x384xf32>
    %21 = arith.mulf %18, %20 : vector<8x384xf32>
    %cst_15 = arith.constant dense<0.000000e+00> : vector<8xf32>
    %22 = vector.multi_reduction <add>, %21, %cst_15 [1] : vector<8x384xf32> to vector<8xf32>
    %23 = vector.shape_cast %22 : vector<8xf32> to vector<8x1xf32>
    %c0_16 = arith.constant 0 : index
    %c0_17 = arith.constant 0 : index
    %24 = memref.load %arg8[%c0_16, %c0_17] : memref<1x1xf32, #tpu.memory_space<smem>>
    %25 = vector.broadcast %24 : f32 to vector<8x1xf32>
    %26 = arith.addf %23, %25 : vector<8x1xf32>
    %c0_18 = arith.constant 0 : index
    %c0_19 = arith.constant 0 : index
    %27 = vector.load %arg9[%c0_18, %c0_19] : memref<8x1xf32, #tpu.memory_space<vmem>>, vector<8x1xf32>
    tpu.vector_store %arg9[%c0_18, %c0_19], %26 {strides = array<i32>} : memref<8x1xf32, #tpu.memory_space<vmem>>, vector<8x1xf32>,
    return
  }
  func.func @transform_0(%arg0: i32) -> (i32, i32) {
    %c0_i32 = arith.constant 0 : i32
    %c0_i32_0 = arith.constant 0 : i32
    return %arg0, %c0_i32 : i32, i32
  }
  func.func @transform_1(%arg0: i32) -> (i32, i32) {
    %c0_i32 = arith.constant 0 : i32
    %c0_i32_0 = arith.constant 0 : i32
    %c0_i32_1 = arith.constant 0 : i32
    return %c0_i32, %c0_i32_0 : i32, i32
  }
  func.func @transform_2(%arg0: i32) -> (i32, i32) {
    %c0_i32 = arith.constant 0 : i32
    %c0_i32_0 = arith.constant 0 : i32
    %c0_i32_1 = arith.constant 0 : i32
    return %c0_i32, %c0_i32_0 : i32, i32
  }
  func.func @transform_3(%arg0: i32) -> (i32, i32) {
    %c0_i32 = arith.constant 0 : i32
    %c0_i32_0 = arith.constant 0 : i32
    %c0_i32_1 = arith.constant 0 : i32
    return %c0_i32, %c0_i32_0 : i32, i32
  }
  func.func @transform_4(%arg0: i32) -> (i32, i32) {
    %c0_i32 = arith.constant 0 : i32
    %c0_i32_0 = arith.constant 0 : i32
    %c0_i32_1 = arith.constant 0 : i32
    return %c0_i32, %c0_i32_0 : i32, i32
  }
  func.func @transform_5(%arg0: i32) -> (i32, i32) {
    %c0_i32 = arith.constant 0 : i32
    %c0_i32_0 = arith.constant 0 : i32
    %c0_i32_1 = arith.constant 0 : i32
    return %c0_i32, %c0_i32_0 : i32, i32
  }
  func.func @transform_6(%arg0: i32) -> (i32, i32) {
    %c0_i32 = arith.constant 0 : i32
    %c0_i32_0 = arith.constant 0 : i32
    %c0_i32_1 = arith.constant 0 : i32
    return %c0_i32, %c0_i32_0 : i32, i32
  }
  func.func @transform_7(%arg0: i32) -> (i32, i32) {
    %c0_i32 = arith.constant 0 : i32
    %c0_i32_0 = arith.constant 0 : i32
    %c0_i32_1 = arith.constant 0 : i32
    return %c0_i32, %c0_i32_0 : i32, i32
  }
  func.func @transform_8(%arg0: i32) -> (i32, i32) {
    %c0_i32 = arith.constant 0 : i32
    %c0_i32_0 = arith.constant 0 : i32
    return %arg0, %c0_i32 : i32, i32
  }
}

</mosaic_0001>

<bundles_post_ra>
// kernel: tpu_custom_call.1
= control target key start
LH: loop header
LB: loop body
LE: loop exit
PB: predicated region body
PF: predicated region fallthrough
CT: control target
= control target key end

     0   :  { %14 = vsyncpa [#allocation4], 0  ;;  %s1712_s0 = inlined_call_operand.hbm [shape: bf16[8,20], index: 0, kind: input, shape index: {}]   ;;  %s1713_s1 = inlined_call_operand.hbm [shape: bf16[20,512], index: 1, kind: input, shape index: {}]   ;;  %s1714_s2 = inlined_call_operand.vmem [shape: f32[1,512], index: 2, kind: input, shape index: {}]   ;;  %s1715_s3 = inlined_call_operand.vmem [shape: f32[1,512], index: 3, kind: input, shape index: {}]   ;;  %s1716_s4 = inlined_call_operand.hbm [shape: bf16[512,384], index: 4, kind: input, shape index: {}]   ;;  %s1717_s5 = inlined_call_operand.vmem [shape: f32[1,384], index: 5, kind: input, shape index: {}]   ;;  %s1718_s6 = inlined_call_operand.vmem [shape: f32[1,384], index: 6, kind: input, shape index: {}]   ;;  %s1719_s7 = inlined_call_operand.<no memory space> [shape: f32[1,1], index: 7, kind: input, shape index: {}]   ;;  %s1720_s8 = inlined_call_operand.vmem [shape: f32[8,1], index: 8, kind: output, shape index: {}]  }
   0x1   :  { %15 = vsyncpa [#allocation6], 0  ;;  %s1557_s27 = smov [#allocation5]   ;;  %s1487_s9 = scalar_lea.hbm %s1713_s1, 768 }
   0x2   :  { %s31_s28 = sshll.u32 %s1557_s27, 4  ;;  %p1488_p0 = scmp.ne.s32.totalorder %s1713_s1, %s1487_s9  ;;  %s32_s28 = int_to_ptr.vmem [resolvable:$true] %s31_s28 }
   0x3   :  { %p1491_p1 = scmp.lt.u32.totalorder %s1487_s9, %s1713_s1 }
   0x5   :  { %p1493_p2 = pnand %p1491_p1, %p1488_p0 }
   0x7   :  { %1496 = shalt.err (!%p1493_p2)
}
   0x8   :  { %s1497_s14 = scalar_lea.vmem %s32_s28, 768  ;;  %p1502_p4 = scmp.lt.s32.totalorder %s32_s28, %s32_s28 }
   0x9   :  { %p1498_p3 = scmp.ne.s32.totalorder %s32_s28, %s1497_s14  ;;  %p1503_p5 = scmp.lt.s32.totalorder %s1497_s14, %s1497_s14 }
   0xb   :  { %p1504_p6 = por %p1503_p5, %p1502_p4 }
   0xd   :  { %p1505_p7 = pnand %p1504_p6, %p1498_p3 }
   0xf   :  { %1508 = shalt.err (!%p1505_p7)
}
  0x10   :  { %s1558_s15 = smov 256   ;;  %s1559_s16 = smov 16  }
  0x11   :  { %37 = dma.hbm_to_vmem [thread:$0]  %s1713_s1, 768, %s32_s28, [#allocation6], %s1558_s15, %s1558_s15, %s1559_s16  }
  0x12   :  { %s1560_s19 = smov [#allocation3]   ;;  %s1561_s21 = smov [#allocation7]  }
  0x13   :  { %s22_s20 = sshll.u32 %s1560_s19, 4  ;;  %s47_s22 = sshll.u32 %s1561_s21, 4  ;;  %s23_s20 = int_to_ptr.vmem [resolvable:$true] %s22_s20  ;;  %s48_s22 = int_to_ptr.vmem [resolvable:$true] %s47_s22 }
  0x14   :  { %s1509_s25 = scalar_lea.hbm %s1712_s0, 64 }
  0x15   :  { %p1510_p8 = scmp.ne.s32.totalorder %s1712_s0, %s1509_s25  ;;  %p1513_p9 = scmp.lt.u32.totalorder %s1509_s25, %s1712_s0 }
  0x17   :  { %p1515_p10 = pnand %p1513_p9, %p1510_p8 }
  0x19   :  { %1518 = shalt.err (!%p1515_p10)
}
  0x1a   :  { %s1519_s1 = scalar_lea.vmem %s23_s20, 64  ;;  %p1524_p12 = scmp.lt.s32.totalorder %s23_s20, %s23_s20 }
  0x1b   :  { %p1520_p11 = scmp.ne.s32.totalorder %s23_s20, %s1519_s1  ;;  %p1525_p13 = scmp.lt.s32.totalorder %s1519_s1, %s1519_s1 }
  0x1d   :  { %p1526_p0 = por %p1525_p13, %p1524_p12 }
  0x1f   :  { %p1527_p1 = pnand %p1526_p0, %p1520_p11 }
  0x21   :  { %1530 = shalt.err (!%p1527_p1)
}
  0x22   :  { %25 = dma.hbm_to_vmem [thread:$0]  %s1712_s0, 64, %s23_s20, [#allocation4]  }
  0x23   :  { %s1531_s12 = scalar_lea.hbm %s1716_s4, 12288 }
  0x24   :  { %p1532_p2 = scmp.ne.s32.totalorder %s1716_s4, %s1531_s12  ;;  %p1535_p3 = scmp.lt.u32.totalorder %s1531_s12, %s1716_s4 }
  0x26   :  { %p1537_p4 = pnand %p1535_p3, %p1532_p2 }
  0x28   :  { %1540 = shalt.err (!%p1537_p4)
}
  0x29   :  { %s1541_s17 = scalar_lea.vmem %s48_s22, 12288  ;;  %p1546_p6 = scmp.lt.s32.totalorder %s48_s22, %s48_s22 }
  0x2a   :  { %p1542_p5 = scmp.ne.s32.totalorder %s48_s22, %s1541_s17  ;;  %p1547_p7 = scmp.lt.s32.totalorder %s1541_s17, %s1541_s17 }
  0x2c   :  { %p1548_p8 = por %p1547_p7, %p1546_p6 }
  0x2e   :  { %p1549_p9 = pnand %p1548_p8, %p1542_p5 }
  0x30   :  { %1552 = shalt.err (!%p1549_p9)
}
  0x31   :  { %s1562_s0 = smov 192   ;;  %s1563_s18 = smov 12  }
  0x32   :  { %53 = dma.hbm_to_vmem [thread:$0]  %s1716_s4, 12288, %s48_s22, [#allocation6], %s1562_s0, %s1562_s0, %s1563_s18  }
  0x33   :  { %1553 = dma.done.wait [#allocation4], 64  }
  0x34   :  { %1554 = vsyncadd [#allocation4], 4294967232 }
  0x35   :  { %1555 = dma.done.wait [#allocation6], 13056  }
  0x36   :  { %1556 = vsyncadd [#allocation6], 4294954240  ;;  %v1564_v0 = vmov 0   ;;  %v1349_v1 = vld [vmem:[#allocation5 + $0x4] ss:$16 sps:$4 sm:$0xff]   ;;  %vm111_vm0 = vcmask 1041408  }
  0x37   :  { %156 = vmatprep.mubr.bf16.mxu1 %v1564_v0  ;;  %v1351_v2 = vld [vmem:[#allocation5] ss:$16 sps:$4 sm:$0xff]   ;;  %124 = vmatprep.subr.bf16.mxu1 %v1349_v1  ;;  %v1356_v6 = vld [vmem:[#allocation5 + $0xc] ss:$16 sps:$4 sm:$0xff]   ;;  %vm107_vm1 = vcmask 162816   ;;  %vm1175_vm2 = vcmask 7168  }
  0x38   :  { %v75_v3 = vld [vmem:[#allocation5 + $0x20] sm:$0x33]  ;;  %125 = vmatpush1.bf16.msra.mxu1 %v1351_v2  ;;  %v76_v7 = vld [vmem:[#allocation5 + $0x28] sm:$0x33]  ;;  %v1361_v10 = vld [vmem:[#allocation7] ss:$12 sps:$4 sm:$0xff]  }
  0x39   :  { %v1188_v4 = vcombine.high %v75_v3, %v75_v3  ;;  %v1187_v5 = vcombine.low %v75_v3, %v75_v3  ;;  %v1359_v9 = vld [vmem:[#allocation7 + $0x4] ss:$12 sps:$4 sm:$0xff]   ;;  %v1362_v11 = vld [vmem:[#allocation7 + $0x1c] ss:$12 sps:$4 sm:$0xff]   ;;  %v70_v12 = vld [vmem:[#allocation3] sm:$0xf]  ;;  %v1190_v14 = vcombine.high %v76_v7, %v76_v7  ;;  %v1189_v15 = vcombine.low %v76_v7, %v76_v7 }
  0x3a   :  { %983 = vmatprep.subr.bf16.mxu0 %v1359_v9  ;;  %v1354_v13 = vld [vmem:[#allocation5 + $0x8] ss:$16 sps:$4 sm:$0xff]   ;;  %v1365_v17 = vld [vmem:[#allocation7 + $0x34] ss:$12 sps:$4 sm:$0xff]   ;;  %v1367_v19 = vld [vmem:[#allocation7 + $0x30] ss:$12 sps:$4 sm:$0xff]  }
  0x3b   :  { %1191 = vmatprep.subr.msk.bf16.mxu1 %vm111_vm0, %v1188_v4  ;;  %v113_v8 = vsel %vm111_vm0, %v1187_v5, 0  ;;  %984 = vmatpush1.bf16.msra.mxu0 %v1361_v10  ;;  %v1364_v16 = vld [vmem:[#allocation7 + $0x18] ss:$12 sps:$4 sm:$0xff]   ;;  %v119_v18 = vsel %vm111_vm0, %v1189_v15, 0  ;;  %v1370_v21 = vld [vmem:[#allocation7 + $0x48] ss:$12 sps:$4 sm:$0xff]  }
  0x3c   :  { %127 = vmatpush1.bf16.msra.mxu1 %v113_v8  ;;  %985 = vmatprep.subr.bf16.mxu0 %v1362_v11  ;;  %v1368_v20 = vld [vmem:[#allocation7 + $0x4c] ss:$12 sps:$4 sm:$0xff]   ;;  %v1371_v22 = vld [vmem:[#allocation7 + $0x64] ss:$12 sps:$4 sm:$0xff]   ;;  %v1385_v23 = vld [vmem:[#allocation7 + $0xc8] ss:$12 sps:$4 sm:$0xff]  }
  0x3d   :  { %165 = vmatprep.subr.bf16.mxu1 %v1356_v6  ;;  %v1387_v24 = vld [vmem:[#allocation7 + $0x8] ss:$12 sps:$4 sm:$0xff]   ;;  %v1373_v25 = vld [vmem:[#allocation7 + $0x60] ss:$12 sps:$4 sm:$0xff]   ;;  %v1395_v29 = vld [vmem:[#allocation7 + $0xf8] ss:$12 sps:$4 sm:$0xff]  }
  0x3e   :  { %v1390_v26 = vld [vmem:[#allocation7 + $0xe0] ss:$12 sps:$4 sm:$0xff]   ;;  %v1374_v28 = vld [vmem:[#allocation7 + $0x7c] ss:$12 sps:$4 sm:$0xff]   ;;  %v1376_v30 = vld [vmem:[#allocation7 + $0x78] ss:$12 sps:$4 sm:$0xff]  }
  0x3f   :  { %1192 = vmatmul.mubr.msk.bf16.vlgmr.msra.gmra.mrb[0].mxu1 %vm107_vm1, %v70_v12  ;;  %986 = vmatpush1.bf16.msra.mxu0 %v1364_v16  ;;  %v1392_v27 = vld [vmem:[#allocation7 + $0x20] ss:$12 sps:$4 sm:$0xff]   ;;  %v1397_v31 = vld [vmem:[#allocation7 + $0x38] ss:$12 sps:$4 sm:$0xff]   ;;  %v1400_v33 = vld [vmem:[#allocation7 + $0x110] ss:$12 sps:$4 sm:$0xff]  }
  0x40   :  { %166 = vmatpush1.bf16.msra.mxu1 %v1354_v13  ;;  %197 = vmatprep.mubr.bf16.mxu1 %v1564_v0  ;;  %v1377_v32 = vld [vmem:[#allocation7 + $0x94] ss:$12 sps:$4 sm:$0xff]   ;;  %v1402_v34 = vld [vmem:[#allocation7 + $0x50] ss:$12 sps:$4 sm:$0xff]   ;;  %v1380_v36 = vld [vmem:[#allocation7 + $0xac] ss:$12 sps:$4 sm:$0xff]   ;;  %v212_v0 = vlaneseq }
  0x41   :  { %1193 = vmatprep.subr.msk.bf16.mxu1 %vm111_vm0, %v1190_v14  ;;  %987 = vmatprep.subr.bf16.mxu0 %v1365_v17  ;;  %v1379_v35 = vld [vmem:[#allocation7 + $0x90] ss:$12 sps:$4 sm:$0xff]   ;;  %v1405_v37 = vld [vmem:[#allocation7 + $0x128] ss:$12 sps:$4 sm:$0xff]   ;;  %v1410_v40 = vld [vmem:[#allocation7 + $0x140] ss:$12 sps:$4 sm:$0xff]  }
  0x42   :  { %v1382_v38 = vld [vmem:[#allocation7 + $0xa8] ss:$12 sps:$4 sm:$0xff]   ;;  %v1383_v41 = vld [vmem:[#allocation7 + $0xc4] ss:$12 sps:$4 sm:$0xff]   ;;  %v1386_v42 = vld [vmem:[#allocation7 + $0xc0] ss:$12 sps:$4 sm:$0xff]  }
  0x43   :  { %988 = vmatpush1.bf16.msra.mxu0 %v1367_v19  ;;  %v1407_v39 = vld [vmem:[#allocation7 + $0x68] ss:$12 sps:$4 sm:$0xff]   ;;  %v1412_v43 = vld [vmem:[#allocation7 + $0x80] ss:$12 sps:$4 sm:$0xff]   ;;  %v1391_v45 = vld [vmem:[#allocation7 + $0xd8] ss:$12 sps:$4 sm:$0xff]  }
  0x44   :  { %168 = vmatpush1.bf16.msra.mxu1 %v119_v18  ;;  %989 = vmatprep.subr.bf16.mxu0 %v1368_v20  ;;  %v1388_v44 = vld [vmem:[#allocation7 + $0xdc] ss:$12 sps:$4 sm:$0xff]   ;;  %v1393_v46 = vld [vmem:[#allocation7 + $0xf4] ss:$12 sps:$4 sm:$0xff]   ;;  %v1398_v48 = vld [vmem:[#allocation7 + $0x10c] ss:$12 sps:$4 sm:$0xff]  }
  0x45   :  { %1291 = vmatprep.subr.bf16.mxu1 %v1385_v23  ;;  %v1396_v47 = vld [vmem:[#allocation7 + $0xf0] ss:$12 sps:$4 sm:$0xff]   ;;  %v1401_v49 = vld [vmem:[#allocation7 + $0x108] ss:$12 sps:$4 sm:$0xff]   ;;  %v1406_v51 = vld [vmem:[#allocation7 + $0x120] ss:$12 sps:$4 sm:$0xff]  }
  0x46   :  { %v1403_v50 = vld [vmem:[#allocation7 + $0x124] ss:$12 sps:$4 sm:$0xff]   ;;  %v1408_v52 = vld [vmem:[#allocation7 + $0x13c] ss:$12 sps:$4 sm:$0xff]   ;;  %v1413_v54 = vld [vmem:[#allocation7 + $0x154] ss:$12 sps:$4 sm:$0xff]  }
  0x47   :  { %1194 = vmatmul.mubr.msk.bf16.vlgmr.msra.gmra.mrb[4].mxu1 %vm107_vm1, %v70_v12  ;;  %990 = vmatpush1.bf16.msra.mxu0 %v1370_v21  ;;  %v1411_v53 = vld [vmem:[#allocation7 + $0x138] ss:$12 sps:$4 sm:$0xff]   ;;  %v1416_v56 = vld [vmem:[#allocation7 + $0x150] ss:$12 sps:$4 sm:$0xff]   ;;  %v1421_v60 = vld [vmem:[#allocation7 + $0x168] ss:$12 sps:$4 sm:$0xff]  }
  0x48   :  { %1292 = vmatpush3.bf16.msra.mxu1 %v1387_v24  ;;  %991 = vmatprep.subr.bf16.mxu0 %v1371_v22  ;;  %v1415_v55 = vld [vmem:[#allocation7 + $0x158] ss:$12 sps:$4 sm:$0xff]   ;;  %v1420_v59 = vld [vmem:[#allocation7 + $0x170] ss:$12 sps:$4 sm:$0xff]   ;;  %v1426_v63 = vld [vmem:[#allocation7 + $0x248] ss:$12 sps:$4 sm:$0xff]  }
  0x49   :  { %1293 = vmatprep.subr.bf16.mxu1 %v1390_v26  ;;  %v1417_v57 = vld [vmem:[#allocation7 + $0x98] ss:$12 sps:$4 sm:$0xff]   ;;  %v1422_v61 = vld [vmem:[#allocation7 + $0xb0] ss:$12 sps:$4 sm:$0xff]   ;;  %v213_v1 = vshrl.u32 %v212_v0, 7 }
  0x4a   :  { %v1418_v58 = vld [vmem:[#allocation7 + $0x16c] ss:$12 sps:$4 sm:$0xff]   ;;  %v1425_v62 = vld [vmem:[#allocation7 + $0x184] ss:$12 sps:$4 sm:$0xff]  }
  0x4b   :  { %992 = vmatpush1.bf16.msra.mxu0 %v1373_v25  ;;  %v1652_v2 = vsub.s32 0, %v213_v1  ;;  %v1657_v3 = vld [vmem:[%s1714_s2] sm:$0xf]  ;;  %v1659_v4 = vsub.s32 1, %v213_v1  ;;  %v226_v12 = vsub.s32 3, %v213_v1 }
  0x4c   :  { %1294 = vmatpush3.bf16.msra.mxu1 %v1392_v27  ;;  %993 = vmatprep.subr.bf16.mxu0 %v1374_v28  ;;  %v1666_v6 = vld [vmem:[%s1715_s3] sm:$0xf]  ;;  %v1445_v0 = vld [vmem:[#allocation7 + $0x1e4] ss:$12 sps:$4 sm:$0xff]  }
  0x4d   :  { %1295 = vmatprep.subr.bf16.mxu1 %v1395_v29  ;;  %v215_v5 = vrot.slane %v1657_v3, %v1652_v2  ;;  %v219_v7 = vrot.slane %v1657_v3, %v1659_v4  ;;  %v277_v8 = vrot.slane %v1666_v6, %v1659_v4  ;;  %v273_v10 = vrot.slane %v1666_v6, %v1652_v2 }
  0x4e   :  { %v227_v17 = vrot.slane %v1657_v3, %v226_v12  ;;  %v285_v19 = vrot.slane %v1666_v6, %v226_v12 }
  0x4f   :  { %994 = vmatpush1.bf16.msra.mxu0 %v1376_v30  ;;  %v232_v9 = vpack.c.bf16 %v215_v5, %v215_v5  ;;  %v233_v11 = vpack.c.bf16 %v219_v7, %v219_v7  ;;  %v291_v13 = vpack.c.bf16 %v277_v8, %v277_v8  ;;  %v290_v15 = vpack.c.bf16 %v273_v10, %v273_v10  ;;  %v1443_v8 = vld [vmem:[#allocation7 + $0x1e0] ss:$12 sps:$4 sm:$0xff]   ;;  %v1450_v10 = vld [vmem:[#allocation7 + $0x1fc] ss:$12 sps:$4 sm:$0xff]  }
  0x50   :  { %1296 = vmatpush3.bf16.msra.mxu1 %v1397_v31  ;;  %995 = vmatprep.subr.bf16.mxu0 %v1377_v32  ;;  %v235_v24 = vpack.c.bf16 %v227_v17, %v227_v17  ;;  %v293_v30 = vpack.c.bf16 %v285_v19, %v285_v19  ;;  %v1453_v19 = vld [vmem:[#allocation7 + $0x210] ss:$12 sps:$4 sm:$0xff]  }
  0x51   :  { %1297 = vmatprep.subr.bf16.mxu1 %v1400_v33  ;;  %v237_v14 = vpack.i.b16 %v232_v9, %v232_v9  ;;  %v244_v16 = vpack.i.b16 %v233_v11, %v233_v11  ;;  %v302_v18 = vpack.i.b16 %v291_v13, %v291_v13  ;;  %v295_v21 = vpack.i.b16 %v290_v15, %v290_v15  ;;  %v1447_v9 = vld [vmem:[#allocation7 + $0x1e8] ss:$12 sps:$4 sm:$0xff]   ;;  %v1448_v13 = vld [vmem:[#allocation7 + $0x1f8] ss:$12 sps:$4 sm:$0xff]  }
  0x52   :  { %v1455_v15 = vld [vmem:[#allocation7 + $0x214] ss:$12 sps:$4 sm:$0xff]  }
  0x53   :  { %996 = vmatpush1.bf16.msra.mxu0 %v1379_v35  ;;  %v242_v20 = vrot.slane %v237_v14, %v1652_v2  ;;  %v249_v23 = vrot.slane %v244_v16, %v1652_v2  ;;  %v307_v29 = vrot.slane %v302_v18, %v1652_v2  ;;  %v300_v33 = vrot.slane %v295_v21, %v1652_v2  ;;  %v1452_v14 = vld [vmem:[#allocation7 + $0x200] ss:$12 sps:$4 sm:$0xff]   ;;  %v1456_v16 = vld [vmem:[#allocation7 + $0x2d8] ss:$12 sps:$4 sm:$0xff]  }
  0x54   :  { %1298 = vmatpush3.bf16.msra.mxu1 %v1402_v34  ;;  %997 = vmatprep.subr.bf16.mxu0 %v1380_v36  ;;  %v258_v35 = vpack.i.b16 %v235_v24, %v235_v24  ;;  %v1460_v21 = vld [vmem:[#allocation7 + $0x22c] ss:$12 sps:$4 sm:$0xff]  }
  0x55   :  { %1299 = vmatprep.subr.bf16.mxu1 %v1405_v37  ;;  %v1423_v37 = vld [vmem:[#allocation7 + $0x180] ss:$12 sps:$4 sm:$0xff]  }
  0x57   :  { %998 = vmatpush1.bf16.msra.mxu0 %v1382_v38  ;;  %v1427_v38 = vld [vmem:[#allocation7 + $0x188] ss:$12 sps:$4 sm:$0xff]  }
  0x58   :  { %1300 = vmatpush3.bf16.msra.mxu1 %v1407_v39  ;;  %999 = vmatprep.subr.bf16.mxu0 %v1383_v41  ;;  %v316_v39 = vpack.i.b16 %v293_v30, %v293_v30  ;;  %v1430_v41 = vld [vmem:[#allocation7 + $0x19c] ss:$12 sps:$4 sm:$0xff]  }
  0x59   :  { %1301 = vmatprep.subr.bf16.mxu1 %v1410_v40  ;;  %v1468_v30 = vld [vmem:[#allocation7 + $0x25c] ss:$12 sps:$4 sm:$0xff]  }
  0x5b   :  { %1000 = vmatpush1.bf16.msra.mxu0 %v1386_v42  ;;  %v1431_v42 = vld [vmem:[#allocation7 + $0x260] ss:$12 sps:$4 sm:$0xff]  }
  0x5c   :  { %1302 = vmatpush3.bf16.msra.mxu1 %v1412_v43  ;;  %1001 = vmatprep.subr.bf16.mxu0 %v1388_v44  ;;  %v263_v44 = vrot.slane %v258_v35, %v1652_v2  ;;  %v1472_v35 = vld [vmem:[#allocation7 + $0x288] ss:$12 sps:$4 sm:$0xff]  }
  0x5d   :  { %1303 = vmatprep.subr.bf16.mxu1 %v1415_v55  ;;  %v1684_v55 = vsub.s32 2, %v213_v1  ;;  %v1446_v1 = vld [vmem:[#allocation7 + $0x2a8] ss:$12 sps:$4 sm:$0xff]  }
  0x5f   :  { %1002 = vmatpush1.bf16.msra.mxu0 %v1391_v45  ;;  %v281_v7 = vrot.slane %v1666_v6, %v1684_v55 }
  0x60   :  { %1003 = vmatprep.subr.bf16.mxu0 %v1393_v46  ;;  %1304 = vmatpush3.bf16.msra.mxu1 %v1417_v57  ;;  %v1428_v46 = vld [vmem:[#allocation7 + $0x198] ss:$12 sps:$4 sm:$0xff]  }
  0x61   :  { %1305 = vmatprep.subr.bf16.mxu1 %v1420_v59  ;;  %v1437_v57 = vld [vmem:[#allocation7 + $0x1b8] ss:$12 sps:$4 sm:$0xff]   ;;  %v292_v12 = vpack.c.bf16 %v281_v7, %v281_v7 }
  0x62   :  { %v1440_v59 = vld [vmem:[#allocation7 + $0x1cc] ss:$12 sps:$4 sm:$0xff]  }
  0x63   :  { %1004 = vmatpush1.bf16.msra.mxu0 %v1396_v47  ;;  %v1432_v47 = vld [vmem:[#allocation7 + $0x1a0] ss:$12 sps:$4 sm:$0xff]   ;;  %v309_v18 = vpack.i.b16 %v292_v12, %v292_v12 }
  0x64   :  { %1005 = vmatprep.subr.bf16.mxu0 %v1398_v48  ;;  %1306 = vmatpush3.bf16.msra.mxu1 %v1422_v61  ;;  %v223_v61 = vrot.slane %v1657_v3, %v1684_v55  ;;  %v1451_v3 = vld [vmem:[#allocation7 + $0x2c0] ss:$12 sps:$4 sm:$0xff]  }
  0x65   :  { %1313 = vmatprep.subr.bf16.mxu1 %v1426_v63  ;;  %v1442_v63 = vld [vmem:[#allocation7 + $0x1d0] ss:$12 sps:$4 sm:$0xff]   ;;  %v314_v24 = vrot.slane %v309_v18, %v1652_v2 }
  0x66   :  { %v234_v5 = vpack.c.bf16 %v223_v61, %v223_v61 }
  0x67   :  { %1006 = vmatpush1.bf16.msra.mxu0 %v1401_v49  ;;  %v321_v49 = vrot.slane %v316_v39, %v1652_v2  ;;  %v1478_v39 = vld [vmem:[#allocation7 + $0x2b8] ss:$12 sps:$4 sm:$0xff]  }
  0x68   :  { %1007 = vmatprep.subr.bf16.mxu0 %v1403_v50  ;;  %v251_v11 = vpack.i.b16 %v234_v5, %v234_v5 }
  0x6a   :  { %v256_v17 = vrot.slane %v251_v11, %v1652_v2 }
  0x6b   :  { %1008 = vmatpush1.bf16.msra.mxu0 %v1406_v51  ;;  %v1435_v51 = vld [vmem:[#allocation7 + $0x1b4] ss:$12 sps:$4 sm:$0xff]  }
  0x6c   :  { %1009 = vmatprep.subr.bf16.mxu0 %v1408_v52  ;;  %v1436_v52 = vld [vmem:[#allocation7 + $0x278] ss:$12 sps:$4 sm:$0xff]  }
  0x6f   :  { %1010 = vmatpush1.bf16.msra.mxu0 %v1411_v53 }
  0x70   :  { %1011 = vmatprep.subr.bf16.mxu0 %v1413_v54 }
  0x73   :  { %1012 = vmatpush1.bf16.msra.mxu0 %v1416_v56  ;;  %v1433_v56 = vld [vmem:[#allocation7 + $0x1b0] ss:$12 sps:$4 sm:$0xff]  }
  0x74   :  { %1013 = vmatprep.subr.bf16.mxu0 %v1418_v58 }
  0x77   :  { %1014 = vmatpush1.bf16.msra.mxu0 %v1421_v60  ;;  %v1441_v60 = vld [vmem:[#allocation7 + $0x290] ss:$12 sps:$4 sm:$0xff]  }
  0x78   :  { %1024 = vmatprep.subr.bf16.mxu0 %v1425_v62  ;;  %v1438_v62 = vld [vmem:[#allocation7 + $0x1c8] ss:$12 sps:$4 sm:$0xff]  }
 0x112   :  { %v158_v22 = vpop.f32.mrb[0].mxu1 }
 0x113   :  { %v206_v25 = vpack.c.bf16 %v158_v22, %v158_v22  ;;  %v160_v26 = vpop.f32.mrb[1].mxu1  ;;  %v1461_v22 = vld [vmem:[#allocation7 + $0x2f0] ss:$12 sps:$4 sm:$0xff]  }
 0x114   :  { %v207_v27 = vpack.c.bf16 %v160_v26, %v160_v26  ;;  %v162_v28 = vpop.f32.mrb[2].mxu1  ;;  %v1462_v26 = vld [vmem:[#allocation7 + $0x230] ss:$12 sps:$4 sm:$0xff]  }
 0x115   :  { %v264_v31 = vadd.bf16 %v242_v20, %v206_v25  ;;  %v163_v32 = vpop.f32.mrb[3].mxu1  ;;  %v1457_v20 = vld [vmem:[#allocation7 + $0x218] ss:$12 sps:$4 sm:$0xff]   ;;  %v1458_v25 = vld [vmem:[#allocation7 + $0x228] ss:$12 sps:$4 sm:$0xff]  }
 0x116   :  { %v265_v34 = vadd.bf16 %v249_v23, %v207_v27  ;;  %v1465_v27 = vld [vmem:[#allocation7 + $0x244] ss:$12 sps:$4 sm:$0xff]   ;;  %v1471_v32 = vld [vmem:[#allocation7 + $0x274] ss:$12 sps:$4 sm:$0xff]  }
 0x117   :  { %v322_v40 = vmax.bf16 %v300_v33, %v264_v31  ;;  %v1466_v31 = vld [vmem:[#allocation7 + $0x258] ss:$12 sps:$4 sm:$0xff]   ;;  %v1469_v33 = vld [vmem:[#allocation7 + $0x270] ss:$12 sps:$4 sm:$0xff]  }
 0x118   :  { %v323_v36 = vmax.bf16 %v307_v29, %v265_v34  ;;  %v1463_v29 = vld [vmem:[#allocation7 + $0x240] ss:$12 sps:$4 sm:$0xff]  }
 0x119   :  { %v1474_v34 = vld [vmem:[#allocation7 + $0x28c] ss:$12 sps:$4 sm:$0xff]  }
 0x11a   :  { %1015 = vmatprep.mubr.bf16.mxu0 %v323_v36  ;;  %1097 = vmatprep.mubr.bf16.mxu1 %v323_v36  ;;  %v1680_v43 = vpop.f32.mrb[4].mxu1  ;;  %v1477_v36 = vld [vmem:[#allocation7 + $0x2a4] ss:$12 sps:$4 sm:$0xff]  }
 0x11b   :  { %1016 = vmatmul.mubr.bf16.vlgmr.msra.gmra.mrb[0].mxu0 %v322_v40  ;;  %1098 = vmatmul.mubr.bf16.vlgmr.msra.gmra.mrb[8].mxu1 %v322_v40  ;;  %v201_v45 = vpop.f32.mrb[5].mxu1  ;;  %v208_v6 = vpack.c.bf16 %v1680_v43, %v1680_v43  ;;  %v1483_v40 = vld [vmem:[#allocation7 + $0x2d4] ss:$12 sps:$4 sm:$0xff]  }
 0x11c   :  { %1025 = vmatpush1.bf16.msra.mxu0 %v1423_v37  ;;  %1314 = vmatpush3.bf16.msra.mxu1 %v1427_v38  ;;  %v209_v48 = vpack.c.bf16 %v201_v45, %v201_v45  ;;  %v203_v50 = vpop.f32.mrb[6].mxu1  ;;  %v1475_v37 = vld [vmem:[#allocation7 + $0x2a0] ss:$12 sps:$4 sm:$0xff]   ;;  %v1480_v38 = vld [vmem:[#allocation7 + $0x2bc] ss:$12 sps:$4 sm:$0xff]  }
 0x11d   :  { %1026 = vmatprep.subr.bf16.mxu0 %v1430_v41  ;;  %1315 = vmatprep.subr.bf16.mxu1 %v1431_v42  ;;  %v204_v53 = vpop.f32.mrb[7].mxu1  ;;  %v266_v23 = vadd.bf16 %v256_v17, %v208_v6  ;;  %v1481_v41 = vld [vmem:[#allocation7 + $0x2d0] ss:$12 sps:$4 sm:$0xff]   ;;  %v1486_v42 = vld [vmem:[#allocation7 + $0x2ec] ss:$12 sps:$4 sm:$0xff]  }
 0x11e   :  { %v267_v54 = vadd.bf16 %v263_v44, %v209_v48  ;;  %v1484_v43 = vld [vmem:[#allocation7 + $0x2e8] ss:$12 sps:$4 sm:$0xff]  }
 0x11f   :  { %v324_v28 = vmax.bf16 %v314_v24, %v266_v23 }
 0x120   :  { %1027 = vmatpush1.bf16.msra.mxu0 %v1428_v46  ;;  %1316 = vmatpush3.bf16.msra.mxu1 %v1432_v47  ;;  %v325_v58 = vmax.bf16 %v321_v49, %v267_v54  ;;  %v454_v49 = vld [vmem:[%s1717_s5] sm:$0x7] }
 0x121   :  { %1028 = vmatprep.subr.bf16.mxu0 %v1435_v51  ;;  %1317 = vmatprep.subr.bf16.mxu1 %v1436_v52  ;;  %v467_v50 = vrot.slane %v454_v49, %v1684_v55 }
 0x122   :  { %1137 = vmatprep.mubr.bf16.mxu1 %v325_v58  ;;  %1056 = vmatprep.mubr.bf16.mxu0 %v325_v58 }
 0x124   :  { %1029 = vmatpush1.bf16.msra.mxu0 %v1433_v56  ;;  %1318 = vmatpush3.bf16.msra.mxu1 %v1437_v57 }
 0x125   :  { %1030 = vmatprep.subr.bf16.mxu0 %v1440_v59  ;;  %1319 = vmatprep.subr.bf16.mxu1 %v1441_v60  ;;  %v459_v59 = vrot.slane %v454_v49, %v1652_v2  ;;  %v463_v60 = vrot.slane %v454_v49, %v1659_v4 }
 0x128   :  { %1031 = vmatpush1.bf16.msra.mxu0 %v1438_v62  ;;  %1320 = vmatpush3.bf16.msra.mxu1 %v1442_v63  ;;  %v1148_v62 = vld [vmem:[%s1718_s6] sm:$0x7] }
 0x129   :  { %1032 = vmatprep.subr.bf16.mxu0 %v1445_v0  ;;  %1321 = vmatprep.subr.bf16.mxu1 %v1446_v1  ;;  %v1153_v0 = vrot.slane %v1148_v62, %v1652_v2  ;;  %v1157_v7 = vrot.slane %v1148_v62, %v1659_v4  ;;  %v1161_v12 = vrot.slane %v1148_v62, %v1684_v55  ;;  %v1173_v2 = vstv %s1719_s7 }
 0x12c   :  { %1033 = vmatpush1.bf16.msra.mxu0 %v1443_v8  ;;  %1322 = vmatpush3.bf16.msra.mxu1 %v1447_v9 }
 0x12d   :  { %1034 = vmatprep.subr.bf16.mxu0 %v1450_v10  ;;  %1323 = vmatprep.subr.bf16.mxu1 %v1451_v3 }
 0x130   :  { %1035 = vmatpush1.bf16.msra.mxu0 %v1448_v13  ;;  %1324 = vmatpush3.bf16.msra.mxu1 %v1452_v14 }
 0x131   :  { %1036 = vmatprep.subr.bf16.mxu0 %v1455_v15  ;;  %1325 = vmatprep.subr.bf16.mxu1 %v1456_v16 }
 0x134   :  { %1037 = vmatpush1.bf16.msra.mxu0 %v1453_v19  ;;  %1326 = vmatpush3.bf16.msra.mxu1 %v1457_v20 }
 0x135   :  { %1038 = vmatprep.subr.bf16.mxu0 %v1460_v21  ;;  %1327 = vmatprep.subr.bf16.mxu1 %v1461_v22 }
 0x138   :  { %1039 = vmatpush1.bf16.msra.mxu0 %v1458_v25  ;;  %1328 = vmatpush3.bf16.msra.mxu1 %v1462_v26 }
 0x139   :  { %1040 = vmatprep.subr.bf16.mxu0 %v1465_v27 }
 0x13b   :  { %1138 = vmatmul.mubr.bf16.vlgmr.msra.gmra.mrb[12].mxu1 %v324_v28 }
 0x13c   :  { %1041 = vmatpush1.bf16.msra.mxu0 %v1463_v29 }
 0x13d   :  { %1042 = vmatprep.subr.bf16.mxu0 %v1468_v30 }
 0x140   :  { %1043 = vmatpush1.bf16.msra.mxu0 %v1466_v31 }
 0x141   :  { %1044 = vmatprep.subr.bf16.mxu0 %v1471_v32 }
 0x144   :  { %1045 = vmatpush1.bf16.msra.mxu0 %v1469_v33 }
 0x145   :  { %1046 = vmatprep.subr.bf16.mxu0 %v1474_v34 }
 0x148   :  { %1047 = vmatpush1.bf16.msra.mxu0 %v1472_v35 }
 0x149   :  { %1048 = vmatprep.subr.bf16.mxu0 %v1477_v36 }
 0x14c   :  { %1049 = vmatpush1.bf16.msra.mxu0 %v1475_v37 }
 0x14d   :  { %1050 = vmatprep.subr.bf16.mxu0 %v1480_v38 }
 0x150   :  { %1051 = vmatpush1.bf16.msra.mxu0 %v1478_v39 }
 0x151   :  { %1052 = vmatprep.subr.bf16.mxu0 %v1483_v40 }
 0x154   :  { %1053 = vmatpush1.bf16.msra.mxu0 %v1481_v41 }
 0x155   :  { %1054 = vmatprep.subr.bf16.mxu0 %v1486_v42 }
 0x158   :  { %1055 = vmatpush1.bf16.msra.mxu0 %v1484_v43 }
 0x15b   :  { %1057 = vmatmul.mubr.bf16.vlgmr.msra.gmra.mrb[0].mxu0 %v324_v28 }
 0x1ee   :  { %v1307_v44 = vpop.f32.mrb[8].mxu1 }
 0x1ef   :  { %v1308_v45 = vpop.f32.mrb[9].mxu1 }
 0x1f0   :  { %v1309_v46 = vadd.f32 %v1308_v45, %v1307_v44  ;;  %v1310_v47 = vpop.f32.mrb[10].mxu1 }
 0x1f1   :  { %v1311_v48 = vpop.f32.mrb[11].mxu1 }
 0x1f2   :  { %v1100_v53 = vadd.f32 %v1309_v46, %v467_v50 }
 0x20e   :  { %v1329_v51 = vpop.f32.mrb[12].mxu1 }
 0x20f   :  { %v1330_v52 = vpop.f32.mrb[13].mxu1 }
 0x210   :  { %v1331_v54 = vadd.f32 %v1330_v52, %v1329_v51  ;;  %v1332_v56 = vpop.f32.mrb[14].mxu1 }
 0x211   :  { %v1333_v57 = vpop.f32.mrb[15].mxu1 }
 0x212   :  { %v1140_v58 = vadd.f32 %v1331_v54, %v1100_v53 }
 0x214   :  { %v1147_v3 = vmax.f32 %v1140_v58, 0.0 }
 0x216   :  { %v1167_v15 = vmul.f32 %v1161_v12, %v1147_v3 }
 0x22e   :  { %v1058_v61 = vpop.f32.mrb[0].mxu0 }
 0x22f   :  { %v1335_v63 = vadd.f32 %v1058_v61, %v459_v59  ;;  %v1060_v1 = vpop.f32.mrb[1].mxu0 }
 0x230   :  { %v1336_v5 = vadd.f32 %v1060_v1, %v463_v60  ;;  %v1062_v8 = vpop.f32.mrb[2].mxu0 }
 0x231   :  { %v1145_v9 = vmax.f32 %v1335_v63, 0.0  ;;  %v1063_v10 = vpop.f32.mrb[3].mxu0 }
 0x232   :  { %v1146_v11 = vmax.f32 %v1336_v5, 0.0 }
 0x233   :  { %v1165_v13 = vmul.f32 %v1153_v0, %v1145_v9 }
 0x234   :  { %v1166_v14 = vmul.f32 %v1157_v7, %v1146_v11 }
 0x236   :  { %v1168_v16 = vadd.f32 %v1166_v14, %v1165_v13 }
 0x238   :  { %v1169_v6 = vadd.f32 %v1168_v16, %v1167_v15 }
 0x23a   :  { %1170 = vadd.xlane.f32.xlu0 %v1169_v6 }
 0x2c7   :  { %v1171_v17 = vpop.xlane.xlu0 %1170 }
 0x2c8   :  { %v1174_v4 = vadd.f32 %v1173_v2, %v1171_v17 }
 0x2ca   :  { %1176 = vst.msk [vmem:[%s1720_s8] sm:$0xff] %vm1175_vm2, %v1174_v4 }
 0x2cb   :  { %1181 = vsyncpa [#allocation4], 1 }
 0x2cc   :  { %1182 = vsyncpa [#allocation6], 1 }

</bundles_post_ra>
